<compile_context>
chip_gen: v5e
topology: v5e:2x2
jax: 0.10.0
libtpu: 0.0.40
codegen_flags: <defaults>
</compile_context>

<pallas_src>
import functools

import jax
import jax.numpy as jnp
from jax.experimental import pallas as pl
from jax.experimental.pallas import tpu as pltpu


def _confidence_decoder_kernel(scores_ref, out_ref):
    """scores_ref: (bt, N) block in VMEM; out_ref: (bt, 1) block in VMEM."""
    s = scores_ref[...]                                        # (bt, N) native dtype
    m = jnp.max(s, axis=-1, keepdims=True).astype(jnp.float32)  # (bt, 1) XLU reduce
    out_ref[...] = jax.nn.sigmoid(1.0 - m).astype(out_ref.dtype)  # EUP + 1 store


def _default_batch_tile(B, N, itemsize, block_budget_bytes=4 << 20):
    """Pick a batch tile: whole batch if it fits a conservative VMEM budget,
    otherwise the largest multiple-of-8 divisor of B under the budget.
    For large batches prefer >=2 grid steps so v7x's 2nd TensorCore is used."""
    row_bytes = max(1, N * itemsize)
    fit_rows = max(8, (block_budget_bytes // row_bytes) // 8 * 8)
    want_split = B >= 1024 and B % 16 == 0   # enough work to shard across TCs
    if B <= fit_rows and not want_split:
        return B                              # single block, single grid step
    best = None
    bt = 8
    cap = min(B // 2, fit_rows)
    while bt <= cap:
        if B % bt == 0:
            best = bt
        bt += 8
    return best if best is not None else B    # fall back: whole batch, one block


def confidence_decoder(scores, *, batch_tile=None):
    """scores: (B, N) float array. Returns (B, 1) = sigmoid(1 - max_1(scores))."""
    B, N = scores.shape
    itemsize = jnp.dtype(scores.dtype).itemsize

    if batch_tile is None:
        bt = _default_batch_tile(B, N, itemsize)
    else:
        bt = min(batch_tile, B)
    assert B % bt == 0, "batch_tile must divide B"
    assert bt == B or bt % 8 == 0, (
        "batch_tile must be a multiple of 8 when smaller than B "
        "(TPU (8,128) block constraint)")

    grid = (B // bt,)

    # Advisory cost hint: B*N compares for the max, B subtracts, B sigmoids.
    cost = pl.CostEstimate(
        flops=B * N + B,
        transcendentals=B,
        bytes_accessed=itemsize * (B * N) + itemsize * B,
    )

    return pl.pallas_call(
        _confidence_decoder_kernel,
        out_shape=jax.ShapeDtypeStruct((B, 1), scores.dtype),
        grid_spec=pl.GridSpec(
            grid=grid,
            # Batch-only tiling; N stays whole (lane-dense, single XLU pass).
            in_specs=[pl.BlockSpec((bt, N), lambda i: (i, 0))],
            out_specs=pl.BlockSpec((bt, 1), lambda i: (i, 0)),
        ),
        # Batch tiles are independent -> parallel (shards across TCs on v7x;
        # collapses to one step at small B on v5e/v6e).
        compiler_params=pltpu.CompilerParams(
            dimension_semantics=("parallel",)),
        cost_estimate=cost,
    )(scores)


def _reference(scores):
    """Pure-JAX reference mirroring the PyTorch module exactly."""
    return jax.nn.sigmoid(jnp.min(1.0 - scores, axis=1, keepdims=True))


if __name__ == "__main__":
    batch = 2
    num_scores = 16

    key = jax.random.PRNGKey(0)
    scores = jax.random.uniform(key, (batch, num_scores), jnp.float32)

    out = confidence_decoder(scores)
    out = jax.block_until_ready(out)

    ref = _reference(scores)
    assert out.shape == (batch, 1), out.shape
    assert jnp.allclose(out, ref, atol=1e-6, rtol=1e-6), (
        f"max abs diff {jnp.max(jnp.abs(out - ref))}")

    print("KERNEL_OK")
</pallas_src>

<mosaic_0001>
module attributes {stable_mosaic.version = 11 : i64} {
  func.func @_confidence_decoder_kernel(%arg0: i32, %arg1: memref<2x16xf32, #tpu.memory_space<vmem>>, %arg2: memref<2x1xf32, #tpu.memory_space<vmem>>) attributes {dimension_semantics = [#tpu.dimension_semantics<parallel>], iteration_bounds = array<i64: 1>, scalar_prefetch = 0 : i64, scratch_operands = 0 : i64, tpu.core_type = #tpu.core_type<tc>, window_params = [{transform_indices = @transform_0, window_bounds = array<i64: 2, 16>}, {transform_indices = @transform_1, window_bounds = array<i64: 2, 1>}]} {
    %c0 = arith.constant 0 : index
    %c0_0 = arith.constant 0 : index
    %0 = vector.load %arg1[%c0, %c0_0] : memref<2x16xf32, #tpu.memory_space<vmem>>, vector<2x16xf32>
    %cst = arith.constant dense<0xFF800000> : vector<2xf32>
    %1 = vector.multi_reduction <maximumf>, %0, %cst [1] : vector<2x16xf32> to vector<2xf32>
    %2 = vector.shape_cast %1 : vector<2xf32> to vector<2x1xf32>
    %cst_1 = arith.constant 1.000000e+00 : f32
    %3 = vector.broadcast %cst_1 : f32 to vector<2x1xf32>
    %4 = arith.subf %3, %2 : vector<2x1xf32>
    %5 = arith.negf %4 : vector<2x1xf32>
    %6 = math.exp %5 : vector<2x1xf32>
    %cst_2 = arith.constant 1.000000e+00 : f32
    %7 = vector.broadcast %cst_2 : f32 to vector<2x1xf32>
    %8 = arith.addf %7, %6 : vector<2x1xf32>
    %9 = arith.divf %7, %8 : vector<2x1xf32>
    %c0_3 = arith.constant 0 : index
    %c0_4 = arith.constant 0 : index
    %10 = vector.load %arg2[%c0_3, %c0_4] : memref<2x1xf32, #tpu.memory_space<vmem>>, vector<2x1xf32>
    tpu.vector_store %arg2[%c0_3, %c0_4], %9 {strides = array<i32>} : memref<2x1xf32, #tpu.memory_space<vmem>>, vector<2x1xf32>,
    return
  }
  func.func @transform_0(%arg0: i32) -> (i32, i32) {
    %c0_i32 = arith.constant 0 : i32
    %c0_i32_0 = arith.constant 0 : i32
    return %arg0, %c0_i32 : i32, i32
  }
  func.func @transform_1(%arg0: i32) -> (i32, i32) {
    %c0_i32 = arith.constant 0 : i32
    %c0_i32_0 = arith.constant 0 : i32
    return %arg0, %c0_i32 : i32, i32
  }
}

</mosaic_0001>

<bundles_post_ra>
// kernel: tpu_custom_call.1
= control target key start
LH: loop header
LB: loop body
LE: loop exit
PB: predicated region body
PF: predicated region fallthrough
CT: control target
= control target key end

     0   :  { %6 = vsyncpa [#allocation3], 0  ;;  %s86_s9 = smov [#allocation2]   ;;  %s103_s0 = inlined_call_operand.hbm [shape: f32[2,16], index: 0, kind: input, shape index: {}]   ;;  %s104_s1 = inlined_call_operand.vmem [shape: f32[2,1], index: 1, kind: output, shape index: {}]  }
   0x1   :  { %s12_s8 = sshll.u32 %s103_s0, 4  ;;  %s14_s10 = sshll.u32 %s86_s9, 4  ;;  %s13_s8 = int_to_ptr.hbm [resolvable:$true] %s12_s8  ;;  %s15_s10 = int_to_ptr.vmem [resolvable:$true] %s14_s10 }
   0x2   :  { %17 = dma.hbm_to_vmem [thread:$0]  %s13_s8, 32, %s15_s10, [#allocation3]  }
   0x3   :  { %84 = dma.done.wait [#allocation3], 32  }
   0x4   :  { %85 = vsyncadd [#allocation3], 4294967264  ;;  %vm23_vm0 = vcmask 123904   ;;  %v22_v0 = vld [vmem:[#allocation2] sm:$0x3]  ;;  %vm47_vm4 = vcmask 1024  }
   0x5   :  { %v24_v1 = vsel %vm23_vm0, %v22_v0, -inf }
   0x6   :  { %25 = vmax.xlane.f32.xlu0 %v24_v1 }
  0x79   :  { %v26_v2 = vpop.xlane.xlu0 %25 }
  0x7a   :  { %v27_v3 = vsub.f32 1.0, %v26_v2 }
  0x7c   :  { %v54_v4 = vmul.f32 -1.442695, %v27_v3 }
  0x7e   :  { %56 = vpow2.f32 %v54_v4 }
  0x84   :  { %v57_v5 = vpop.eup %56 }
  0x85   :  { %v31_v6 = vadd.f32 1.0, %v57_v5 }
  0x87   :  { %58 = vrcp.f32 %v31_v6  ;;  %v43_v10 = vand.u32 2147483648, %v31_v6  ;;  %v41_v12 = vand.u32 2147483647, %v31_v6  ;;  %vm37_vm2 = vweird.f32 %v31_v6 }
  0x89   :  { %v44_v14 = vor.u32 1.1754944e-38, %v43_v10  ;;  %vm42_vm5 = vcmp.eq.f32.partialorder %v41_v12, 8.507059e+37 }
  0x8d   :  { %v59_v7 = vpop.eup %58 }
  0x8e   :  { %v33_v8 = vmul.f32 %v59_v7, %v31_v6  ;;  %vm38_vm1 = vweird.f32 %v59_v7 }
  0x8f   :  { %vm39_vm3 = vmor %vm37_vm2, %vm38_vm1 }
  0x90   :  { %v34_v9 = vsub.f32 1.0, %v33_v8 }
  0x92   :  { %v35_v11 = vmul.f32 %v59_v7, %v34_v9 }
  0x94   :  { %v36_v13 = vadd.f32 %v59_v7, %v35_v11 }
  0x96   :  { %v40_v15 = vsel %vm39_vm3, %v59_v7, %v36_v13 }
  0x97   :  { %v45_v16 = vsel %vm42_vm5, %v44_v14, %v40_v15 }
  0x98   :  { %48 = vst.msk [vmem:[%s104_s1] sm:$0x3] %vm47_vm4, %v45_v16 }
  0x99   :  { %53 = vsyncpa [#allocation3], 1 }

</bundles_post_ra>
